<compile_context>
chip_gen: v6e
topology: v6e:2x2x1
jax: 0.10.0
libtpu: 0.0.40
codegen_flags: <defaults>
</compile_context>

<pallas_src>
import jax
import jax.numpy as jnp
from jax.experimental import pallas as pl
from jax.experimental.pallas import tpu as pltpu


D_IN, D_H1, D_H2, D_OUT = 10, 32, 16, 1


def pixelnet_kernel(xt_ref, w1_ref, b1_ref, w2_ref, b2_ref, w3_ref, b3_ref, ot_ref):
    # xt:  (D_IN,  tile_b)   batch on the lane (last) axis
    # w*:  (out, in)         same layout as torch nn.Linear .weight
    # b*:  (out, 1)          lane-broadcast bias
    # ot:  (D_OUT, tile_b)   lane-dense output -> unmasked stores
    xt = xt_ref[...].astype(jnp.float32)

    h1 = jnp.dot(w1_ref[...], xt, preferred_element_type=jnp.float32) + b1_ref[...]
    h1 = jnp.maximum(h1, 0.0)

    h2 = jnp.dot(w2_ref[...], h1, preferred_element_type=jnp.float32) + b2_ref[...]
    h2 = jnp.maximum(h2, 0.0)

    h3 = jnp.dot(w3_ref[...], h2, preferred_element_type=jnp.float32) + b3_ref[...]
    ot_ref[...] = h3.astype(ot_ref.dtype)


def _choose_tile_b(B, tile_b):
    if tile_b is not None:
        return tile_b
    if B <= 128:
        return B                                # single full-extent block (always legal)
    return min(1024, (B // 128) * 128)          # lane-dense multiple of 128, ~1K rows/tile


def pixelnet_forward(x, params, *, tile_b=None):
    """x: (B, 10) float32 -> (B, 1) float32.  params: torch-layout (out, in) weights."""
    B, d_in = x.shape
    assert d_in == D_IN

    w1, b1 = params["w1"], params["b1"]   # (32, 10), (32, 1)
    w2, b2 = params["w2"], params["b2"]   # (16, 32), (16, 1)
    w3, b3 = params["w3"], params["b3"]   # (1, 16),  (1, 1)

    tb = _choose_tile_b(B, tile_b)
    # Block legality: last dim of a block must equal the full array dim or divide 128.
    assert tb == B or tb % 128 == 0, "tile_b must equal B or be a multiple of 128"

    # Pad batch to a whole number of lane tiles, transpose so batch sits on lanes.
    Bp = ((B + tb - 1) // tb) * tb
    xt = x.T                                           # (10, B)
    if Bp != B:
        xt = jnp.pad(xt, ((0, 0), (0, Bp - B)))
    num_tiles = Bp // tb

    def rep(shape):
        # Constant block index -> stays VMEM-resident across grid steps (no re-DMA).
        return pl.BlockSpec(shape, lambda i: (0, 0))

    flops = 2 * Bp * (D_IN * D_H1 + D_H1 * D_H2 + D_H2 * D_OUT)
    bytes_accessed = 4 * (Bp * D_IN + Bp * D_OUT
                          + w1.size + b1.size + w2.size + b2.size + w3.size + b3.size)

    ot = pl.pallas_call(
        pixelnet_kernel,
        out_shape=jax.ShapeDtypeStruct((D_OUT, Bp), jnp.float32),
        grid_spec=pltpu.PrefetchScalarGridSpec(
            num_scalar_prefetch=0,
            grid=(num_tiles,),
            in_specs=[
                pl.BlockSpec((D_IN, tb), lambda i: (0, i)),   # x tile: batch on lanes
                rep(w1.shape), rep(b1.shape),
                rep(w2.shape), rep(b2.shape),
                rep(w3.shape), rep(b3.shape),
            ],
            out_specs=pl.BlockSpec((D_OUT, tb), lambda i: (0, i)),
        ),
        compiler_params=pltpu.CompilerParams(
            # Batch tiles are independent -> shard across v7x's 2 TensorCores.
            dimension_semantics=("parallel",),
            # Tiny per-tile footprint; explicit limit is safe on v5e/v6e/v7x alike.
            vmem_limit_bytes=32 * 1024 * 1024,
        ),
        cost_estimate=pl.CostEstimate(
            flops=flops, transcendentals=0, bytes_accessed=bytes_accessed),
    )(xt, w1, b1, w2, b2, w3, b3)

    return ot[:, :B].T                                 # (B, 1)


def init_params(key):
    """PyTorch nn.Linear default init: U(-1/sqrt(fan_in), 1/sqrt(fan_in)), torch layout."""
    dims = [(D_IN, D_H1), (D_H1, D_H2), (D_H2, D_OUT)]
    params = {}
    keys = jax.random.split(key, 2 * len(dims))
    for idx, (fan_in, fan_out) in enumerate(dims):
        bound = 1.0 / jnp.sqrt(float(fan_in))
        w = jax.random.uniform(keys[2 * idx], (fan_out, fan_in),
                               minval=-bound, maxval=bound, dtype=jnp.float32)
        b = jax.random.uniform(keys[2 * idx + 1], (fan_out, 1),
                               minval=-bound, maxval=bound, dtype=jnp.float32)
        params[f"w{idx + 1}"] = w
        params[f"b{idx + 1}"] = b
    return params


def pixelnet_ref(x, params):
    h = jnp.maximum(x @ params["w1"].T + params["b1"].T, 0.0)
    h = jnp.maximum(h @ params["w2"].T + params["b2"].T, 0.0)
    return h @ params["w3"].T + params["b3"].T


if __name__ == "__main__":
    key = jax.random.PRNGKey(0)
    k_param, k_x = jax.random.split(key)
    params = init_params(k_param)

    # Small case (matches the module spec; single full-extent lane block).
    x_small = jax.random.normal(k_x, (8, D_IN), dtype=jnp.float32)
    out_small = jax.block_until_ready(pixelnet_forward(x_small, params))
    ref_small = pixelnet_ref(x_small, params)
    assert out_small.shape == (8, 1), out_small.shape
    assert jnp.allclose(out_small, ref_small, atol=1e-4, rtol=1e-4), "mismatch (small)"

    # Multi-tile case: lane-dense 1024-row tiles, grid=(2,), pipelined + parallel.
    x_big = jax.random.normal(k_x, (2048, D_IN), dtype=jnp.float32)
    out_big = jax.block_until_ready(pixelnet_forward(x_big, params, tile_b=1024))
    assert out_big.shape == (2048, 1), out_big.shape
    assert jnp.allclose(out_big, pixelnet_ref(x_big, params), atol=1e-4, rtol=1e-4), \
        "mismatch (big)"

    # Ragged case: B=300 padded to 384, tile_b=128, grid=(3,); pad rows sliced off.
    x_rag = jax.random.normal(k_x, (300, D_IN), dtype=jnp.float32)
    out_rag = jax.block_until_ready(pixelnet_forward(x_rag, params, tile_b=128))
    assert out_rag.shape == (300, 1), out_rag.shape
    assert jnp.allclose(out_rag, pixelnet_ref(x_rag, params), atol=1e-4, rtol=1e-4), \
        "mismatch (ragged)"

    print("KERNEL_OK")
</pallas_src>

<mosaic_0001>
module attributes {stable_mosaic.version = 11 : i64} {
  func.func @pixelnet_kernel(%arg0: i32, %arg1: memref<10x8xf32, #tpu.memory_space<vmem>>, %arg2: memref<32x10xf32, #tpu.memory_space<vmem>>, %arg3: memref<32x1xf32, #tpu.memory_space<vmem>>, %arg4: memref<16x32xf32, #tpu.memory_space<vmem>>, %arg5: memref<16x1xf32, #tpu.memory_space<vmem>>, %arg6: memref<1x16xf32, #tpu.memory_space<vmem>>, %arg7: memref<1x1xf32, #tpu.memory_space<vmem>>, %arg8: memref<1x8xf32, #tpu.memory_space<vmem>>) attributes {dimension_semantics = [#tpu.dimension_semantics<parallel>], iteration_bounds = array<i64: 1>, scalar_prefetch = 0 : i64, scratch_operands = 0 : i64, tpu.core_type = #tpu.core_type<tc>, window_params = [{transform_indices = @transform_0, window_bounds = array<i64: 10, 8>}, {pipeline_mode = #tpu.pipeline_mode<synchronous>, transform_indices = @transform_1, window_bounds = array<i64: 32, 10>}, {pipeline_mode = #tpu.pipeline_mode<synchronous>, transform_indices = @transform_2, window_bounds = array<i64: 32, 1>}, {pipeline_mode = #tpu.pipeline_mode<synchronous>, transform_indices = @transform_3, window_bounds = array<i64: 16, 32>}, {pipeline_mode = #tpu.pipeline_mode<synchronous>, transform_indices = @transform_4, window_bounds = array<i64: 16, 1>}, {pipeline_mode = #tpu.pipeline_mode<synchronous>, transform_indices = @transform_5, window_bounds = array<i64: 1, 16>}, {pipeline_mode = #tpu.pipeline_mode<synchronous>, transform_indices = @transform_6, window_bounds = array<i64: 1, 1>}, {transform_indices = @transform_7, window_bounds = array<i64: 1, 8>}]} {
    %c0 = arith.constant 0 : index
    %c0_0 = arith.constant 0 : index
    %0 = vector.load %arg1[%c0, %c0_0] : memref<10x8xf32, #tpu.memory_space<vmem>>, vector<10x8xf32>
    %c0_1 = arith.constant 0 : index
    %c0_2 = arith.constant 0 : index
    %1 = vector.load %arg2[%c0_1, %c0_2] : memref<32x10xf32, #tpu.memory_space<vmem>>, vector<32x10xf32>
    %cst = arith.constant dense<0.000000e+00> : vector<32x8xf32>
    %2 = tpu.matmul %1, %0, %cst {dimension_numbers = #tpu.dot_dimension_numbers<[1], [0], [0], [1], [0, 0, 1, 1], [], []>} : vector<32x10xf32>, vector<10x8xf32>, vector<32x8xf32> -> vector<32x8xf32>
    %c0_3 = arith.constant 0 : index
    %c0_4 = arith.constant 0 : index
    %3 = vector.load %arg3[%c0_3, %c0_4] : memref<32x1xf32, #tpu.memory_space<vmem>>, vector<32x1xf32>
    %4 = vector.broadcast %3 : vector<32x1xf32> to vector<32x8xf32>
    %5 = arith.addf %2, %4 : vector<32x8xf32>
    %cst_5 = arith.constant 0.000000e+00 : f32
    %6 = vector.broadcast %cst_5 : f32 to vector<32x8xf32>
    %7 = arith.maximumf %5, %6 : vector<32x8xf32>
    %c0_6 = arith.constant 0 : index
    %c0_7 = arith.constant 0 : index
    %8 = vector.load %arg4[%c0_6, %c0_7] : memref<16x32xf32, #tpu.memory_space<vmem>>, vector<16x32xf32>
    %cst_8 = arith.constant dense<0.000000e+00> : vector<16x8xf32>
    %9 = tpu.matmul %8, %7, %cst_8 {dimension_numbers = #tpu.dot_dimension_numbers<[1], [0], [0], [1], [0, 0, 1, 1], [], []>} : vector<16x32xf32>, vector<32x8xf32>, vector<16x8xf32> -> vector<16x8xf32>
    %c0_9 = arith.constant 0 : index
    %c0_10 = arith.constant 0 : index
    %10 = vector.load %arg5[%c0_9, %c0_10] : memref<16x1xf32, #tpu.memory_space<vmem>>, vector<16x1xf32>
    %11 = vector.broadcast %10 : vector<16x1xf32> to vector<16x8xf32>
    %12 = arith.addf %9, %11 : vector<16x8xf32>
    %cst_11 = arith.constant 0.000000e+00 : f32
    %13 = vector.broadcast %cst_11 : f32 to vector<16x8xf32>
    %14 = arith.maximumf %12, %13 : vector<16x8xf32>
    %c0_12 = arith.constant 0 : index
    %c0_13 = arith.constant 0 : index
    %15 = vector.load %arg6[%c0_12, %c0_13] : memref<1x16xf32, #tpu.memory_space<vmem>>, vector<1x16xf32>
    %cst_14 = arith.constant dense<0.000000e+00> : vector<1x8xf32>
    %16 = tpu.matmul %15, %14, %cst_14 {dimension_numbers = #tpu.dot_dimension_numbers<[1], [0], [0], [1], [0, 0, 1, 1], [], []>} : vector<1x16xf32>, vector<16x8xf32>, vector<1x8xf32> -> vector<1x8xf32>
    %c0_15 = arith.constant 0 : index
    %c0_16 = arith.constant 0 : index
    %17 = vector.load %arg7[%c0_15, %c0_16] : memref<1x1xf32, #tpu.memory_space<vmem>>, vector<1x1xf32>
    %18 = vector.broadcast %17 : vector<1x1xf32> to vector<1x8xf32>
    %19 = arith.addf %16, %18 : vector<1x8xf32>
    %c0_17 = arith.constant 0 : index
    %c0_18 = arith.constant 0 : index
    %20 = vector.load %arg8[%c0_17, %c0_18] : memref<1x8xf32, #tpu.memory_space<vmem>>, vector<1x8xf32>
    tpu.vector_store %arg8[%c0_17, %c0_18], %19 {strides = array<i32>} : memref<1x8xf32, #tpu.memory_space<vmem>>, vector<1x8xf32>,
    return
  }
  func.func @transform_0(%arg0: i32) -> (i32, i32) {
    %c0_i32 = arith.constant 0 : i32
    %c0_i32_0 = arith.constant 0 : i32
    return %c0_i32, %arg0 : i32, i32
  }
  func.func @transform_1(%arg0: i32) -> (i32, i32) {
    %c0_i32 = arith.constant 0 : i32
    %c0_i32_0 = arith.constant 0 : i32
    %c0_i32_1 = arith.constant 0 : i32
    return %c0_i32, %c0_i32_0 : i32, i32
  }
  func.func @transform_2(%arg0: i32) -> (i32, i32) {
    %c0_i32 = arith.constant 0 : i32
    %c0_i32_0 = arith.constant 0 : i32
    %c0_i32_1 = arith.constant 0 : i32
    return %c0_i32, %c0_i32_0 : i32, i32
  }
  func.func @transform_3(%arg0: i32) -> (i32, i32) {
    %c0_i32 = arith.constant 0 : i32
    %c0_i32_0 = arith.constant 0 : i32
    %c0_i32_1 = arith.constant 0 : i32
    return %c0_i32, %c0_i32_0 : i32, i32
  }
  func.func @transform_4(%arg0: i32) -> (i32, i32) {
    %c0_i32 = arith.constant 0 : i32
    %c0_i32_0 = arith.constant 0 : i32
    %c0_i32_1 = arith.constant 0 : i32
    return %c0_i32, %c0_i32_0 : i32, i32
  }
  func.func @transform_5(%arg0: i32) -> (i32, i32) {
    %c0_i32 = arith.constant 0 : i32
    %c0_i32_0 = arith.constant 0 : i32
    %c0_i32_1 = arith.constant 0 : i32
    return %c0_i32, %c0_i32_0 : i32, i32
  }
  func.func @transform_6(%arg0: i32) -> (i32, i32) {
    %c0_i32 = arith.constant 0 : i32
    %c0_i32_0 = arith.constant 0 : i32
    %c0_i32_1 = arith.constant 0 : i32
    return %c0_i32, %c0_i32_0 : i32, i32
  }
  func.func @transform_7(%arg0: i32) -> (i32, i32) {
    %c0_i32 = arith.constant 0 : i32
    %c0_i32_0 = arith.constant 0 : i32
    return %c0_i32, %arg0 : i32, i32
  }
}

</mosaic_0001>

<bundles_post_ra>
// kernel: tpu_custom_call.1
= control target key start
LH: loop header
LB: loop body
LE: loop exit
PB: predicated region body
PF: predicated region fallthrough
CT: control target
= control target key end

     0   :  { %s544_s0 = inlined_call_operand.vmem [shape: f32[10,8], index: 0, kind: input, shape index: {}]   ;;  %s545_s1 = inlined_call_operand.vmem [shape: f32[32,10], index: 1, kind: input, shape index: {}]   ;;  %s546_s2 = inlined_call_operand.vmem [shape: f32[32,1], index: 2, kind: input, shape index: {}]   ;;  %s547_s3 = inlined_call_operand.vmem [shape: f32[16,32], index: 3, kind: input, shape index: {}]   ;;  %s548_s4 = inlined_call_operand.vmem [shape: f32[16,1], index: 4, kind: input, shape index: {}]   ;;  %s549_s5 = inlined_call_operand.vmem [shape: f32[1,16], index: 5, kind: input, shape index: {}]   ;;  %s550_s6 = inlined_call_operand.<no memory space> [shape: f32[1,1], index: 6, kind: input, shape index: {}]   ;;  %s551_s7 = inlined_call_operand.hbm [shape: f32[1,8], index: 7, kind: output, shape index: {}]  }
   0x1   :  { %v12_v0 = vstv %s550_s6 }
   0x2   :  { %13 = vst [vmem:[#allocation2] sm:$0x1] %v12_v0 }
   0x3   :  { %v30_v1 = vld [vmem:[%s544_s0 + $0x8] sm:$0x3]  ;;  %vm72_vm0 = vcmask 1041408   ;;  %v29_v2 = vld [vmem:[%s544_s0] sm:$0xff]  ;;  %vm59_vm1 = vcmask 80896   ;;  %v443_v5 = vmov 0  }
   0x4   :  { %v31_v3 = vld [vmem:[%s545_s1] sm:$0xff]  ;;  %387 = vmatprep.subr.msk.mxu0 %vm72_vm0, %v30_v1  ;;  %v32_v4 = vld [vmem:[%s545_s1 + $0x8] sm:$0xff]  ;;  %419 = vset.pattern.permute.xlu0 %v443_v5  ;;  %v38_v6 = vld [vmem:[%s546_s2 + $0x18] sm:$0xff] }
   0x5   :  { %391 = vmatprep.mubr.msk.f32.mxu0 %vm59_vm1, %v31_v3  ;;  %388 = vmatpush3.msk.msra.mxu0 %vm72_vm0, %v30_v1  ;;  %v33_v7 = vld [vmem:[%s545_s1 + $0x10] sm:$0xff]  ;;  %v36_v8 = vld [vmem:[%s546_s2 + $0x8] sm:$0xff] }
   0x6   :  { %389 = vmatprep.subr.mxu0 %v29_v2  ;;  %56 = vperm.xlu0 %419, %v38_v6   ;;  %v37_v9 = vld [vmem:[%s546_s2 + $0x10] sm:$0xff] }
   0x7   :  { %390 = vmatpush3.msra.mxu0 %v29_v2  ;;  %420 = vset.pattern.permute.xlu1 %v443_v5 }
   0x8   :  { %14 = vsyncpa [#allocation4], 0  ;;  %392 = vmatmul.mubr.msk.f32.vlgmr.msra.gmra.mxu0 %vm59_vm1, %v32_v4  ;;  %46 = vperm.xlu1 %420, %v36_v8   ;;  %v34_v10 = vld [vmem:[%s545_s1 + $0x18] sm:$0xff]  ;;  %v35_v11 = vld [vmem:[%s546_s2] sm:$0xff]  ;;  %vm179_vm2 = vcmask 261120   ;;  %v444_v33 = vmov 0.0   ;;  %v270_v43 = vlaneseq }
   0x9   :  { %394 = vmatprep.mubr.msk.f32.mxu0 %vm59_vm1, %v33_v7  ;;  %v168_v12 = vld [vmem:[%s548_s4 + $0x8] sm:$0xff]  ;;  %v167_v13 = vld [vmem:[%s548_s4] sm:$0xff]  ;;  %408 = vmatprep.subr.mxu0 %v444_v33  ;;  %vm445_vm3 = vmmov 0   ;;  %vm274_vm4 = vcmask 130048   ;;  %vm348_vm5 = vcmask 57344  }
   0xa   :  { %51 = vperm.xlu0 %419, %v37_v9   ;;  %v264_v14 = vld [vmem:[#allocation2] sm:$0x1]  ;;  %v166_v32 = vld [vmem:[%s547_s3 + $0x8] sm:$0xff]  ;;  %v271_v44 = vshrl.u32 %v270_v43, 7 }
   0xb   :  { %v165_v15 = vld [vmem:[%s547_s3] sm:$0xff]  ;;  %s446_s3 = smov [#allocation3]  }
   0xc   :  { %395 = vmatmul.mubr.msk.f32.gmra.mxu0 %vm59_vm1, %v34_v10  ;;  %41 = vperm.xlu1 %420, %v35_v11   ;;  %v263_v42 = vld [vmem:[%s549_s5] sm:$0x1]  ;;  %v272_v45 = vsub.s32 0, %v271_v44  ;;  %s356_s28 = sshll.u32 %s446_s3, 4  ;;  %s357_s28 = int_to_ptr.vmem [resolvable:$true] %s356_s28 }
   0xd   :  { %405 = vmatprep.mubr.msk.f32.mxu1 %vm179_vm2, %v165_v15  ;;  %412 = vmatprep.mubr.msk.f32.mxu0 %vm445_vm3, %v444_v33  ;;  %s421_s29 = scalar_lea.vmem %s357_s28, 16  ;;  %s425_s5 = scalar_lea.vmem %s357_s28, 32 }
   0xe   :  { %176 = vperm.xlu0 %419, %v168_v12   ;;  %p422_p0 = scmp.ne.s32.totalorder %s357_s28, %s421_s29  ;;  %p426_p1 = scmp.lt.s32.totalorder %s357_s28, %s357_s28 }
   0xf   :  { %p427_p2 = scmp.lt.s32.totalorder %s425_s5, %s421_s29 }
  0x10   :  { %171 = vperm.xlu1 %420, %v167_v13  }
  0x11   :  { %p428_p3 = por %p427_p2, %p426_p1 }
  0x12   :  { %267 = vperm.xlu0 %419, %v264_v14  }
  0x13   :  { %p429_p4 = pnand %p428_p3, %p422_p0 }
  0x81   :  { %v57_v16 = vpop.permute.xlu0 %56 }
  0x83   :  { %v47_v17 = vpop.permute.xlu1 %46 }
  0x85   :  { %v52_v21 = vpop.permute.xlu0 %51 }
  0x87   :  { %v42_v23 = vpop.permute.xlu1 %41 }
  0x89   :  { %v177_v34 = vpop.permute.xlu0 %176 }
  0x8b   :  { %v172_v37 = vpop.permute.xlu1 %171 }
  0x8d   :  { %v268_v46 = vpop.permute.xlu0 %267 }
  0x8e   :  { %v273_v47 = vrot.slane %v268_v46, %v272_v45 }
  0xc8   :  { %v393_v18 = vpop.f32.mrf.mxu0 }
  0xc9   :  { %v148_v25 = vadd.f32 %v393_v18, %v47_v17 }
  0xca   :  { %v142_v19 = vpop.f32.mrf.mxu0 }
  0xcb   :  { %v143_v28 = vadd.f32 %v142_v19, %v42_v23  ;;  %v162_v30 = vmax.f32 %v148_v25, 0.0 }
  0xcc   :  { %v396_v20 = vpop.f32.mrf.mxu0 }
  0xcd   :  { %v158_v22 = vadd.f32 %v396_v20, %v57_v16  ;;  %v161_v31 = vmax.f32 %v143_v28, 0.0 }
  0xce   :  { %v152_v24 = vpop.f32.mrf.mxu0 }
  0xcf   :  { %v164_v26 = vmax.f32 %v158_v22, 0.0  ;;  %v153_v27 = vadd.f32 %v152_v24, %v52_v21 }
  0xd1   :  { %v163_v29 = vmax.f32 %v153_v27, 0.0  ;;  %397 = vmatprep.subr.mxu1 %v164_v26 }
  0xd2   :  { %398 = vmatpush3.msra.mxu1 %v164_v26 }
  0xd3   :  { %399 = vmatprep.subr.mxu1 %v163_v29 }
  0xd4   :  { %400 = vmatpush3.msra.mxu1 %v163_v29 }
  0xd5   :  { %401 = vmatprep.subr.mxu1 %v162_v30 }
  0xd6   :  { %402 = vmatpush3.msra.mxu1 %v162_v30 }
  0xd7   :  { %403 = vmatprep.subr.mxu1 %v161_v31 }
  0xd8   :  { %404 = vmatpush3.msra.mxu1 %v161_v31 }
  0xd9   :  { %406 = vmatmul.mubr.msk.f32.vlgmr.msra.gmra.mxu1 %vm179_vm2, %v166_v32 }
 0x199   :  { %v407_v35 = vpop.f32.mrf.mxu1 }
 0x19a   :  { %v258_v36 = vadd.f32 %v407_v35, %v177_v34 }
 0x19b   :  { %v252_v38 = vpop.f32.mrf.mxu1 }
 0x19c   :  { %v262_v39 = vmax.f32 %v258_v36, 0.0  ;;  %v253_v40 = vadd.f32 %v252_v38, %v172_v37 }
 0x19e   :  { %v261_v41 = vmax.f32 %v253_v40, 0.0  ;;  %409 = vmatpush3.msra.mxu0 %v262_v39 }
 0x19f   :  { %410 = vmatprep.subr.mxu0 %v444_v33 }
 0x1a0   :  { %411 = vmatpush3.msra.mxu0 %v261_v41 }
 0x1a1   :  { %413 = vmatmul.mubr.msk.f32.vlgmr.msra.gmra.mxu0 %vm274_vm4, %v263_v42 }
 0x261   :  { %v344_v48 = vpop.f32.mrf.mxu0 }
 0x262   :  { %v345_v49 = vadd.f32 %v344_v48, %v273_v47 }
 0x263   :  { %v414_v50 = vpop.f32.mrf.mxu0 }
 0x264   :  { %349 = vst.msk [vmem:[#allocation3] sm:$0x1] %vm348_vm5, %v345_v49 }
 0x265   :  { %432 = shalt.err (!%p429_p4)
}
 0x266   :  { %359 = dma.vmem_to_hbm [thread:$0]  %s357_s28, 16, %s551_s7, [#allocation4]  }
 0x267   :  { %441 = dma.done.wait [#allocation4], 16  }
 0x268   :  { %442 = vsyncadd [#allocation4], 4294967280 }
 0x269   :  { %363 = vsyncpa [#allocation4], 1 }

</bundles_post_ra>
